<compile_context>
chip_gen: v5e
topology: v5e:2x2
jax: 0.10.0
libtpu: 0.0.40
codegen_flags: <defaults>
</compile_context>

<pallas_src>
import jax
import jax.numpy as jnp
from jax.experimental import pallas as pl
from jax.experimental.pallas import tpu as pltpu


def _combination_normal_kernel(equ_ref, nrm_ref, slab_ref, out_ref):
    # equ_ref / out_ref: [tile_n, D*C]  (lane-dense)
    # nrm_ref:           [tile_n, 3]
    # slab_ref:          [3, D*C]  (W embedded at degree d = i+1, zeros elsewhere)
    acc = equ_ref[...]
    nrm = nrm_ref[...]
    slab = slab_ref[...]
    # out[n, j] = equ[n, j] + sum_i nrm[n, i] * slab[i, j]
    # Only one slab row is nonzero per column, so this exactly reproduces
    #   out[n, d, c] = equ[n, d, c] + normal[n, d-1] * W[c]  for d in 1..3.
    for i in range(3):
        acc = acc + nrm[:, i:i + 1] * slab[i:i + 1, :]
    out_ref[...] = acc


def _round_up(x, m):
    return (x + m - 1) // m * m


def combination_normal_forward(equ, normal, weight, *, tile_n=None):
    """equ: [N, D, C]; normal: [N, 3]; weight: [C] or [C, 1] (nn.Linear(1, C).weight)."""
    N, D, C = equ.shape
    assert D >= 4, "equ must have at least 4 entries along axis 1"
    DC = D * C
    dtype = equ.dtype
    itemsize = equ.dtype.itemsize

    # ---- wrapper-side layout plumbing (free reshape + tiny constants) ----
    equ2 = equ.reshape(N, DC)            # lane-dense view of equ
    nrm = normal.astype(dtype)           # [N, 3]

    w = weight.reshape(-1).astype(dtype)  # [C]
    slab = jnp.zeros((3, DC), dtype)
    for i in range(3):                    # normal component i feeds degree d = i+1
        slab = slab.at[i, (i + 1) * C:(i + 2) * C].set(w)

    # ---- tiling over N: ~2 MiB equ/out blocks, many grid steps ----
    if tile_n is None:
        row_bytes = DC * itemsize
        target_block_bytes = 2 * 1024 * 1024
        tile_n = max(8, (target_block_bytes // row_bytes) // 8 * 8)
    tile_n = min(_round_up(tile_n, 8), _round_up(N, 8))
    grid = (pl.cdiv(N, tile_n),)          # partial last block: OOB stores are masked

    # VMEM budget: double-buffered equ + out + nrm blocks plus the tiny slab.
    block_bytes = tile_n * DC * itemsize
    nrm_bytes = tile_n * 3 * itemsize
    slab_bytes = 3 * DC * itemsize
    needed = 2 * (2 * block_bytes + nrm_bytes + slab_bytes)
    vmem_limit = int(min(max(3 * needed, 16 * 1024 * 1024), 64 * 1024 * 1024))

    out2 = pl.pallas_call(
        _combination_normal_kernel,
        out_shape=jax.ShapeDtypeStruct((N, DC), dtype),
        grid=grid,
        in_specs=[
            pl.BlockSpec((tile_n, DC), lambda i: (i, 0)),
            pl.BlockSpec((tile_n, 3), lambda i: (i, 0)),
            pl.BlockSpec((3, DC), lambda i: (0, 0)),
        ],
        out_specs=pl.BlockSpec((tile_n, DC), lambda i: (i, 0)),
        compiler_params=pltpu.CompilerParams(
            dimension_semantics=("parallel",),
            vmem_limit_bytes=vmem_limit,
        ),
    )(equ2, nrm, slab)

    return out2.reshape(N, D, C)


if __name__ == "__main__":
    key = jax.random.PRNGKey(0)
    k_equ, k_nrm, k_w = jax.random.split(key, 3)

    N, D, C = 8, 4, 32  # points, equ-degree axis (>=4), channels
    equ = jax.random.normal(k_equ, (N, D, C), dtype=jnp.float32)
    normal = jax.random.normal(k_nrm, (N, 3), dtype=jnp.float32)
    # nn.Linear(1, C, bias=False).weight has shape [C, 1].
    weight = jax.random.normal(k_w, (C, 1), dtype=jnp.float32)

    out = combination_normal_forward(equ, normal, weight)
    out = jax.block_until_ready(out)

    # Pure-JAX reference of the PyTorch semantics.
    w_vec = weight.reshape(-1)
    ref = equ.at[:, 1:4, :].add(normal[:, :, None] * w_vec[None, None, :])
    assert out.shape == (N, D, C)
    assert jnp.allclose(out, ref, atol=1e-5, rtol=1e-5), "mismatch vs reference"

    # TODO(synk): the companion `normal` module (Open3D KD-tree normal estimation)
    # is a host-side library call with no Pallas equivalent; not implemented here.
    print("KERNEL_OK")
</pallas_src>

<mosaic_0001>
module attributes {stable_mosaic.version = 11 : i64} {
  func.func @_combination_normal_kernel(%arg0: i32, %arg1: memref<8x128xf32, #tpu.memory_space<vmem>>, %arg2: memref<8x3xf32, #tpu.memory_space<vmem>>, %arg3: memref<3x128xf32, #tpu.memory_space<vmem>>, %arg4: memref<8x128xf32, #tpu.memory_space<vmem>>) attributes {dimension_semantics = [#tpu.dimension_semantics<parallel>], iteration_bounds = array<i64: 1>, scalar_prefetch = 0 : i64, scratch_operands = 0 : i64, tpu.core_type = #tpu.core_type<tc>, window_params = [{transform_indices = @transform_0, window_bounds = array<i64: 8, 128>}, {transform_indices = @transform_1, window_bounds = array<i64: 8, 3>}, {pipeline_mode = #tpu.pipeline_mode<synchronous>, transform_indices = @transform_2, window_bounds = array<i64: 3, 128>}, {transform_indices = @transform_3, window_bounds = array<i64: 8, 128>}]} {
    %c0 = arith.constant 0 : index
    %c0_0 = arith.constant 0 : index
    %0 = vector.load %arg1[%c0, %c0_0] : memref<8x128xf32, #tpu.memory_space<vmem>>, vector<8x128xf32>
    %c0_1 = arith.constant 0 : index
    %c0_2 = arith.constant 0 : index
    %1 = vector.load %arg2[%c0_1, %c0_2] : memref<8x3xf32, #tpu.memory_space<vmem>>, vector<8x3xf32>
    %c0_3 = arith.constant 0 : index
    %c0_4 = arith.constant 0 : index
    %2 = vector.load %arg3[%c0_3, %c0_4] : memref<3x128xf32, #tpu.memory_space<vmem>>, vector<3x128xf32>
    %3 = vector.extract_strided_slice %1 {offsets = [0, 0], sizes = [8, 1], strides = [1, 1]} : vector<8x3xf32> to vector<8x1xf32>
    %4 = vector.extract_strided_slice %2 {offsets = [0, 0], sizes = [1, 128], strides = [1, 1]} : vector<3x128xf32> to vector<1x128xf32>
    %5 = vector.broadcast %3 : vector<8x1xf32> to vector<8x128xf32>
    %6 = vector.broadcast %4 : vector<1x128xf32> to vector<8x128xf32>
    %7 = arith.mulf %5, %6 : vector<8x128xf32>
    %8 = arith.addf %0, %7 : vector<8x128xf32>
    %9 = vector.extract_strided_slice %1 {offsets = [0, 1], sizes = [8, 1], strides = [1, 1]} : vector<8x3xf32> to vector<8x1xf32>
    %10 = vector.extract_strided_slice %2 {offsets = [1, 0], sizes = [1, 128], strides = [1, 1]} : vector<3x128xf32> to vector<1x128xf32>
    %11 = vector.broadcast %9 : vector<8x1xf32> to vector<8x128xf32>
    %12 = vector.broadcast %10 : vector<1x128xf32> to vector<8x128xf32>
    %13 = arith.mulf %11, %12 : vector<8x128xf32>
    %14 = arith.addf %8, %13 : vector<8x128xf32>
    %15 = vector.extract_strided_slice %1 {offsets = [0, 2], sizes = [8, 1], strides = [1, 1]} : vector<8x3xf32> to vector<8x1xf32>
    %16 = vector.extract_strided_slice %2 {offsets = [2, 0], sizes = [1, 128], strides = [1, 1]} : vector<3x128xf32> to vector<1x128xf32>
    %17 = vector.broadcast %15 : vector<8x1xf32> to vector<8x128xf32>
    %18 = vector.broadcast %16 : vector<1x128xf32> to vector<8x128xf32>
    %19 = arith.mulf %17, %18 : vector<8x128xf32>
    %20 = arith.addf %14, %19 : vector<8x128xf32>
    %c0_5 = arith.constant 0 : index
    %c0_6 = arith.constant 0 : index
    %21 = vector.load %arg4[%c0_5, %c0_6] : memref<8x128xf32, #tpu.memory_space<vmem>>, vector<8x128xf32>
    tpu.vector_store %arg4[%c0_5, %c0_6], %20 {strides = array<i32>} : memref<8x128xf32, #tpu.memory_space<vmem>>, vector<8x128xf32>,
    return
  }
  func.func @transform_0(%arg0: i32) -> (i32, i32) {
    %c0_i32 = arith.constant 0 : i32
    %c0_i32_0 = arith.constant 0 : i32
    return %arg0, %c0_i32 : i32, i32
  }
  func.func @transform_1(%arg0: i32) -> (i32, i32) {
    %c0_i32 = arith.constant 0 : i32
    %c0_i32_0 = arith.constant 0 : i32
    return %arg0, %c0_i32 : i32, i32
  }
  func.func @transform_2(%arg0: i32) -> (i32, i32) {
    %c0_i32 = arith.constant 0 : i32
    %c0_i32_0 = arith.constant 0 : i32
    %c0_i32_1 = arith.constant 0 : i32
    return %c0_i32, %c0_i32_0 : i32, i32
  }
  func.func @transform_3(%arg0: i32) -> (i32, i32) {
    %c0_i32 = arith.constant 0 : i32
    %c0_i32_0 = arith.constant 0 : i32
    return %arg0, %c0_i32 : i32, i32
  }
}

</mosaic_0001>

<bundles_post_ra>
// kernel: tpu_custom_call.1
= control target key start
LH: loop header
LB: loop body
LE: loop exit
PB: predicated region body
PF: predicated region fallthrough
CT: control target
= control target key end

     0   :  { %v91_v1 = vmov 0   ;;  %v92_v2 = vmov 2   ;;  %s127_s0 = inlined_call_operand.vmem [shape: f32[8,128], index: 0, kind: input, shape index: {}]   ;;  %s128_s1 = inlined_call_operand.vmem [shape: f32[8,3], index: 1, kind: input, shape index: {}]   ;;  %s129_s2 = inlined_call_operand.vmem [shape: f32[3,128], index: 2, kind: input, shape index: {}]   ;;  %s130_s3 = inlined_call_operand.hbm [shape: f32[8,128], index: 3, kind: output, shape index: {}]  }
   0x1   :  { %v16_v0 = vld [vmem:[%s128_s1] sm:$0xff]  ;;  %61 = vset.pattern.permute.xlu0 %v91_v1  ;;  %63 = vset.pattern.permute.xlu1 %v92_v2 }
   0x2   :  { %8 = vsyncpa [#allocation3], 0  ;;  %20 = vperm.xlu0 %61, %v16_v0   ;;  %34 = vperm.xlu1 %63, %v16_v0   ;;  %v93_v3 = vmov 1   ;;  %v17_v4 = vld [vmem:[%s129_s2] sm:$0x7]  ;;  %s94_s17 = smov [#allocation2]  }
   0x3   :  { %v23_v6 = vperm.slane %v17_v4, 0  ;;  %v30_v8 = vperm.slane %v17_v4, 1  ;;  %v37_v9 = vperm.slane %v17_v4, 2  ;;  %v15_v10 = vld [vmem:[%s127_s0] sm:$0xff]  ;;  %s46_s18 = sshll.u32 %s94_s17, 4  ;;  %s48_s2 = sshll.u32 %s130_s3, 4  ;;  %s47_s18 = int_to_ptr.vmem [resolvable:$true] %s46_s18  ;;  %s49_s2 = int_to_ptr.hbm [resolvable:$true] %s48_s2 }
   0xa   :  { %62 = vset.pattern.permute.xlu0 %v93_v3 }
   0xb   :  { %27 = vperm.xlu0 %62, %v16_v0  }
  0x13   :  { %64 = vset.pattern.permute.xlu0 %v92_v2 }
  0x74   :  { %v21_v5 = vpop.permute.xlu0 %20  ;;  %v35_v11 = vpop.permute.xlu1 %34 }
  0x75   :  { %v24_v7 = vmul.f32 %v23_v6, %v21_v5  ;;  %v38_v15 = vmul.f32 %v37_v9, %v35_v11 }
  0x77   :  { %v25_v13 = vadd.f32 %v24_v7, %v15_v10 }
  0x7d   :  { %v28_v12 = vpop.permute.xlu0 %27 }
  0x7e   :  { %v31_v14 = vmul.f32 %v30_v8, %v28_v12 }
  0x80   :  { %v32_v16 = vadd.f32 %v31_v14, %v25_v13 }
  0x82   :  { %v39_v17 = vadd.f32 %v38_v15, %v32_v16 }
  0x84   :  { %40 = vst [vmem:[#allocation2] sm:$0xff] %v39_v17 }
  0x85   :  { %51 = dma.vmem_to_hbm [thread:$0]  %s47_s18, 128, %s49_s2, [#allocation3]  }
  0x86   :  { %89 = dma.done.wait [#allocation3], 128  }
  0x87   :  { %90 = vsyncadd [#allocation3], 4294967168 }
  0x88   :  { %56 = vsyncpa [#allocation3], 1 }

</bundles_post_ra>
